<compile_context>
chip_gen: v7x
topology: tpu7x:2x2x1
jax: 0.10.0
libtpu: 0.0.40
codegen_flags: <defaults>
</compile_context>

<pallas_src>
import jax
import jax.numpy as jnp
from jax.experimental import pallas as pl
from jax.experimental.pallas import tpu as pltpu

IN_FEATURES = 512
OUT_FEATURES = 6
NEG_SLOPE = 0.2


def tdclass_kernel(x1_ref, x2_ref, w_ref, b_ref, o_ref):
    # elementwise product of the two inputs (VPU)
    x = x1_ref[...] * x2_ref[...]                                      # (TB, 512) f32
    # linear layer: x @ W^T + b   (W passed pre-transposed -> (512, 6))  (MXU)
    logits = jnp.dot(x, w_ref[...], preferred_element_type=jnp.float32)
    logits = logits + b_ref[...]                                       # (TB, 6) + (1, 6)
    # leaky_relu with negative_slope = 0.2
    act = jnp.where(logits >= 0, logits, NEG_SLOPE * logits)
    # softmax over dim=1 (the 6 output classes); all reductions are row-wise,
    # which keeps the ragged-final-block (masked OOB rows) scheme correct.
    m = jnp.max(act, axis=-1, keepdims=True)
    e = jnp.exp(act - m)
    denom = jnp.sum(e, axis=-1, keepdims=True)
    o_ref[...] = (e / denom).astype(o_ref.dtype)   # exact division: DMA-bound anyway


def _round_up(x, m):
    return -(-x // m) * m


def _choose_tile(batch, tb_cap):
    """Pick the batch tile: multiple of 8, <= tb_cap, >=2 (even) tiles when there
    is enough work so both v7x TensorCores get a share, and sized so the ragged
    slack in the last block is at most a few rows."""
    b8 = _round_up(max(batch, 1), 8)
    n = 1 if b8 <= tb_cap else -(-b8 // tb_cap)
    if n == 1 and b8 > 512:          # enough work to split across 2 TCs (v7x)
        n = 2
    if 1 < n < 8 and n % 2 == 1:     # even small tile counts -> balanced TCs
        n += 1
    tb = _round_up(-(-batch // n), 8)
    return max(8, min(tb, tb_cap))


def tdclass_forward(x1, x2, weight, bias, p=None, *, tb_cap=4096):
    """x1, x2: (B, 512) f32; weight: (6, 512) f32; bias: (6,) f32 -> (B, 6) f32.
    `p` is accepted for signature parity with the PyTorch module and ignored."""
    del p
    B = x1.shape[0]
    TB = _choose_tile(B, tb_cap)
    num_tiles = pl.cdiv(B, TB)       # ragged final block: OOB stores are masked

    w_t = weight.T                       # (512, 6) -- resident in VMEM
    b2d = bias.reshape(1, OUT_FEATURES)  # keep 2-D for TPU layout

    cost = pl.CostEstimate(
        flops=B * (IN_FEATURES                       # x1*x2
                   + 2 * IN_FEATURES * OUT_FEATURES  # matmul
                   + 6 * OUT_FEATURES),              # bias/lrelu/softmax misc
        transcendentals=B * OUT_FEATURES,            # exp
        bytes_accessed=(2 * B * IN_FEATURES * 4      # x1, x2 reads
                        + B * OUT_FEATURES * 4       # output writes
                        + IN_FEATURES * OUT_FEATURES * 4
                        + OUT_FEATURES * 4),
    )

    return pl.pallas_call(
        tdclass_kernel,
        out_shape=jax.ShapeDtypeStruct((B, OUT_FEATURES), jnp.float32),
        grid=(num_tiles,),
        in_specs=[
            pl.BlockSpec((TB, IN_FEATURES), lambda i: (i, 0)),
            pl.BlockSpec((TB, IN_FEATURES), lambda i: (i, 0)),
            pl.BlockSpec((IN_FEATURES, OUT_FEATURES), lambda i: (0, 0)),
            pl.BlockSpec((1, OUT_FEATURES), lambda i: (0, 0)),
        ],
        out_specs=pl.BlockSpec((TB, OUT_FEATURES), lambda i: (i, 0)),
        compiler_params=pltpu.CompilerParams(
            dimension_semantics=("parallel",),   # megacore sharding on v7x
            vmem_limit_bytes=48 << 20,           # room for TB=4096 double-buffered
        ),
        cost_estimate=cost,
    )(x1, x2, w_t, b2d)


def reference_forward(x1, x2, weight, bias):
    x = x1 * x2
    logits = x @ weight.T + bias
    act = jnp.where(logits >= 0, logits, NEG_SLOPE * logits)
    return jax.nn.softmax(act, axis=1)


if __name__ == "__main__":
    key = jax.random.PRNGKey(0)
    _, _, kw, kb = jax.random.split(key, 4)

    # Deterministic nn.Linear(512, 6)-style init: U(-1/sqrt(512), 1/sqrt(512))
    bound = 1.0 / (IN_FEATURES ** 0.5)
    weight = jax.random.uniform(kw, (OUT_FEATURES, IN_FEATURES),
                                minval=-bound, maxval=bound, dtype=jnp.float32)
    bias = jax.random.uniform(kb, (OUT_FEATURES,),
                              minval=-bound, maxval=bound, dtype=jnp.float32)

    # B=8: exact-fit block. B=20: exercises the ragged (masked) final block.
    for B in (8, 20):
        k1, k2 = jax.random.split(jax.random.fold_in(key, B), 2)
        x1 = jax.random.normal(k1, (B, IN_FEATURES), dtype=jnp.float32)
        x2 = jax.random.normal(k2, (B, IN_FEATURES), dtype=jnp.float32)

        out = jax.block_until_ready(tdclass_forward(x1, x2, weight, bias, p=0.5))
        ref = reference_forward(x1, x2, weight, bias)

        assert out.shape == (B, OUT_FEATURES)
        assert jnp.allclose(out, ref, atol=1e-5, rtol=1e-5), f"mismatch vs reference (B={B})"

    print("KERNEL_OK")
</pallas_src>

<mosaic_0001>
module attributes {stable_mosaic.version = 11 : i64} {
  func.func @tdclass_kernel(%arg0: i32, %arg1: memref<8x512xf32, #tpu.memory_space<vmem>>, %arg2: memref<8x512xf32, #tpu.memory_space<vmem>>, %arg3: memref<512x6xf32, #tpu.memory_space<vmem>>, %arg4: memref<1x6xf32, #tpu.memory_space<vmem>>, %arg5: memref<8x6xf32, #tpu.memory_space<vmem>>) attributes {dimension_semantics = [#tpu.dimension_semantics<parallel>], iteration_bounds = array<i64: 1>, scalar_prefetch = 0 : i64, scratch_operands = 0 : i64, tpu.core_type = #tpu.core_type<tc>, window_params = [{transform_indices = @transform_0, window_bounds = array<i64: 8, 512>}, {transform_indices = @transform_1, window_bounds = array<i64: 8, 512>}, {pipeline_mode = #tpu.pipeline_mode<synchronous>, transform_indices = @transform_2, window_bounds = array<i64: 512, 6>}, {pipeline_mode = #tpu.pipeline_mode<synchronous>, transform_indices = @transform_3, window_bounds = array<i64: 1, 6>}, {transform_indices = @transform_4, window_bounds = array<i64: 8, 6>}]} {
    %c0 = arith.constant 0 : index
    %c0_0 = arith.constant 0 : index
    %0 = vector.load %arg1[%c0, %c0_0] : memref<8x512xf32, #tpu.memory_space<vmem>>, vector<8x512xf32>
    %c0_1 = arith.constant 0 : index
    %c0_2 = arith.constant 0 : index
    %1 = vector.load %arg2[%c0_1, %c0_2] : memref<8x512xf32, #tpu.memory_space<vmem>>, vector<8x512xf32>
    %2 = arith.mulf %0, %1 : vector<8x512xf32>
    %c0_3 = arith.constant 0 : index
    %c0_4 = arith.constant 0 : index
    %3 = vector.load %arg3[%c0_3, %c0_4] : memref<512x6xf32, #tpu.memory_space<vmem>>, vector<512x6xf32>
    %cst = arith.constant dense<0.000000e+00> : vector<8x6xf32>
    %4 = tpu.matmul %2, %3, %cst {dimension_numbers = #tpu.dot_dimension_numbers<[1], [0], [0], [1], [0, 0, 1, 1], [], []>} : vector<8x512xf32>, vector<512x6xf32>, vector<8x6xf32> -> vector<8x6xf32>
    %c0_5 = arith.constant 0 : index
    %c0_6 = arith.constant 0 : index
    %5 = vector.load %arg4[%c0_5, %c0_6] : memref<1x6xf32, #tpu.memory_space<vmem>>, vector<1x6xf32>
    %6 = vector.broadcast %5 : vector<1x6xf32> to vector<8x6xf32>
    %7 = arith.addf %4, %6 : vector<8x6xf32>
    %cst_7 = arith.constant 0.000000e+00 : f32
    %8 = vector.broadcast %cst_7 : f32 to vector<8x6xf32>
    %9 = arith.cmpf oge, %7, %8 : vector<8x6xf32>
    %cst_8 = arith.constant 2.000000e-01 : f32
    %10 = vector.broadcast %cst_8 : f32 to vector<8x6xf32>
    %11 = arith.mulf %10, %7 : vector<8x6xf32>
    %12 = arith.select %9, %7, %11 : vector<8x6xi1>, vector<8x6xf32>
    %cst_9 = arith.constant dense<0xFF800000> : vector<8xf32>
    %13 = vector.multi_reduction <maximumf>, %12, %cst_9 [1] : vector<8x6xf32> to vector<8xf32>
    %14 = vector.shape_cast %13 : vector<8xf32> to vector<8x1xf32>
    %15 = vector.broadcast %14 : vector<8x1xf32> to vector<8x6xf32>
    %16 = arith.subf %12, %15 : vector<8x6xf32>
    %17 = math.exp %16 : vector<8x6xf32>
    %cst_10 = arith.constant dense<0.000000e+00> : vector<8xf32>
    %18 = vector.multi_reduction <add>, %17, %cst_10 [1] : vector<8x6xf32> to vector<8xf32>
    %19 = vector.shape_cast %18 : vector<8xf32> to vector<8x1xf32>
    %20 = vector.broadcast %19 : vector<8x1xf32> to vector<8x6xf32>
    %21 = arith.divf %17, %20 : vector<8x6xf32>
    %c0_11 = arith.constant 0 : index
    %c0_12 = arith.constant 0 : index
    %22 = vector.load %arg5[%c0_11, %c0_12] : memref<8x6xf32, #tpu.memory_space<vmem>>, vector<8x6xf32>
    tpu.vector_store %arg5[%c0_11, %c0_12], %21 {strides = array<i32>} : memref<8x6xf32, #tpu.memory_space<vmem>>, vector<8x6xf32>,
    return
  }
  func.func @transform_0(%arg0: i32) -> (i32, i32) {
    %c0_i32 = arith.constant 0 : i32
    %c0_i32_0 = arith.constant 0 : i32
    return %arg0, %c0_i32 : i32, i32
  }
  func.func @transform_1(%arg0: i32) -> (i32, i32) {
    %c0_i32 = arith.constant 0 : i32
    %c0_i32_0 = arith.constant 0 : i32
    return %arg0, %c0_i32 : i32, i32
  }
  func.func @transform_2(%arg0: i32) -> (i32, i32) {
    %c0_i32 = arith.constant 0 : i32
    %c0_i32_0 = arith.constant 0 : i32
    %c0_i32_1 = arith.constant 0 : i32
    return %c0_i32, %c0_i32_0 : i32, i32
  }
  func.func @transform_3(%arg0: i32) -> (i32, i32) {
    %c0_i32 = arith.constant 0 : i32
    %c0_i32_0 = arith.constant 0 : i32
    %c0_i32_1 = arith.constant 0 : i32
    return %c0_i32, %c0_i32_0 : i32, i32
  }
  func.func @transform_4(%arg0: i32) -> (i32, i32) {
    %c0_i32 = arith.constant 0 : i32
    %c0_i32_0 = arith.constant 0 : i32
    return %arg0, %c0_i32 : i32, i32
  }
}

</mosaic_0001>

<bundles_post_ra>
// kernel: tpu_custom_call.1
= control target key start
LH: loop header
LB: loop body
LE: loop exit
PB: predicated region body
PF: predicated region fallthrough
CT: control target
= control target key end

     0   :  { %s695_s0 = inlined_call_operand.vmem [shape: f32[8,512], index: 0, kind: input, shape index: {}]   ;;  %s696_s1 = inlined_call_operand.vmem [shape: f32[8,512], index: 1, kind: input, shape index: {}]   ;;  %s697_s2 = inlined_call_operand.vmem [shape: f32[512,6], index: 2, kind: input, shape index: {}]   ;;  %s698_s3 = inlined_call_operand.vmem [shape: f32[1,6], index: 3, kind: input, shape index: {}]   ;;  %s699_s4 = inlined_call_operand.hbm [shape: f32[8,6], index: 4, kind: output, shape index: {}]  }
   0x1   :  { %v46_v0 = vld [vmem:[%s697_s2 + $0x80] sm:$0xff]  ;;  %v47_v1 = vld [vmem:[%s697_s2 + $0x88] sm:$0xff]  ;;  %v48_v11 = vld [vmem:[%s697_s2 + $0x90] sm:$0xff] }
   0x2   :  { %v30_v2 = vld [vmem:[%s697_s2] sm:$0xff]  ;;  %v342_v3 = vpack.c.bf16 %v47_v1, %v46_v0  ;;  %v31_v4 = vld [vmem:[%s697_s2 + $0x8] sm:$0xff]  ;;  %v49_v13 = vld [vmem:[%s697_s2 + $0x98] sm:$0xff] }
   0x3   :  { %v78_v5 = vld [vmem:[%s697_s2 + $0x180] sm:$0xff]  ;;  %v79_v6 = vld [vmem:[%s697_s2 + $0x188] sm:$0xff]  ;;  %v344_v7 = vpack.c.bf16 %v31_v4, %v30_v2  ;;  %v32_v14 = vld [vmem:[%s697_s2 + $0x10] sm:$0xff]  ;;  %v346_v16 = vpack.c.bf16 %v49_v13, %v48_v11 }
   0x4   :  { %v374_v8 = vpack.c.bf16 %v79_v6, %v78_v5  ;;  %v62_v9 = vld [vmem:[%s697_s2 + $0x100] sm:$0xff]  ;;  %v63_v10 = vld [vmem:[%s697_s2 + $0x108] sm:$0xff]  ;;  %343 = vmatprep.subr.bf16.mxu0 %v342_v3  ;;  %v33_v15 = vld [vmem:[%s697_s2 + $0x18] sm:$0xff] }
   0x5   :  { %v376_v12 = vpack.c.bf16 %v63_v10, %v62_v9  ;;  %345 = vmatpush3.bf16.msra.mxu0 %v344_v7  ;;  %v348_v17 = vpack.c.bf16 %v33_v15, %v32_v14  ;;  %v80_v18 = vld [vmem:[%s697_s2 + $0x190] sm:$0xff]  ;;  %v81_v19 = vld [vmem:[%s697_s2 + $0x198] sm:$0xff]  ;;  %v50_v23 = vld [vmem:[%s697_s2 + $0xa0] sm:$0xff] }
   0x6   :  { %375 = vmatprep.subr.bf16.mxu1 %v374_v8  ;;  %v64_v20 = vld [vmem:[%s697_s2 + $0x110] sm:$0xff]  ;;  %v378_v21 = vpack.c.bf16 %v81_v19, %v80_v18  ;;  %v65_v22 = vld [vmem:[%s697_s2 + $0x118] sm:$0xff]  ;;  %v51_v24 = vld [vmem:[%s697_s2 + $0xa8] sm:$0xff]  ;;  %347 = vmatprep.subr.bf16.mxu0 %v346_v16 }
   0x7   :  { %377 = vmatpush3.bf16.msra.mxu1 %v376_v12  ;;  %v380_v25 = vpack.c.bf16 %v65_v22, %v64_v20  ;;  %v350_v26 = vpack.c.bf16 %v51_v24, %v50_v23  ;;  %v34_v27 = vld [vmem:[%s697_s2 + $0x20] sm:$0xff]  ;;  %v35_v28 = vld [vmem:[%s697_s2 + $0x28] sm:$0xff]  ;;  %v52_v35 = vld [vmem:[%s697_s2 + $0xb0] sm:$0xff] }
   0x8   :  { %v82_v29 = vld [vmem:[%s697_s2 + $0x1a0] sm:$0xff]  ;;  %379 = vmatprep.subr.bf16.mxu1 %v378_v21  ;;  %v83_v30 = vld [vmem:[%s697_s2 + $0x1a8] sm:$0xff]  ;;  %v352_v33 = vpack.c.bf16 %v35_v28, %v34_v27  ;;  %v53_v36 = vld [vmem:[%s697_s2 + $0xb8] sm:$0xff] }
   0x9   :  { %v66_v31 = vld [vmem:[%s697_s2 + $0x120] sm:$0xff]  ;;  %v67_v32 = vld [vmem:[%s697_s2 + $0x128] sm:$0xff]  ;;  %349 = vmatpush3.bf16.msra.mxu0 %v348_v17  ;;  %v382_v34 = vpack.c.bf16 %v83_v30, %v82_v29  ;;  %v36_v37 = vld [vmem:[%s697_s2 + $0x30] sm:$0xff]  ;;  %v354_v39 = vpack.c.bf16 %v53_v36, %v52_v35 }
   0xa   :  { %351 = vmatprep.subr.bf16.mxu0 %v350_v26  ;;  %v384_v38 = vpack.c.bf16 %v67_v32, %v66_v31  ;;  %v37_v40 = vld [vmem:[%s697_s2 + $0x38] sm:$0xff]  ;;  %v84_v41 = vld [vmem:[%s697_s2 + $0x1b0] sm:$0xff]  ;;  %v54_v46 = vld [vmem:[%s697_s2 + $0xc0] sm:$0xff] }
   0xb   :  { %381 = vmatpush3.bf16.msra.mxu1 %v380_v25  ;;  %v85_v42 = vld [vmem:[%s697_s2 + $0x1b8] sm:$0xff]  ;;  %v68_v44 = vld [vmem:[%s697_s2 + $0x130] sm:$0xff]  ;;  %v55_v47 = vld [vmem:[%s697_s2 + $0xc8] sm:$0xff]  ;;  %v356_v48 = vpack.c.bf16 %v37_v40, %v36_v37 }
   0xc   :  { %383 = vmatprep.subr.bf16.mxu1 %v382_v34  ;;  %v386_v43 = vpack.c.bf16 %v85_v42, %v84_v41  ;;  %v69_v45 = vld [vmem:[%s697_s2 + $0x138] sm:$0xff]  ;;  %v86_v49 = vld [vmem:[%s697_s2 + $0x1c0] sm:$0xff]  ;;  %v87_v50 = vld [vmem:[%s697_s2 + $0x1c8] sm:$0xff]  ;;  %v358_v52 = vpack.c.bf16 %v55_v47, %v54_v46 }
   0xd   :  { %353 = vmatpush3.bf16.msra.mxu0 %v352_v33  ;;  %v388_v51 = vpack.c.bf16 %v69_v45, %v68_v44  ;;  %v38_v53 = vld [vmem:[%s697_s2 + $0x40] sm:$0xff]  ;;  %v39_v54 = vld [vmem:[%s697_s2 + $0x48] sm:$0xff]  ;;  %v390_v56 = vpack.c.bf16 %v87_v50, %v86_v49  ;;  %v56_v58 = vld [vmem:[%s697_s2 + $0xd0] sm:$0xff] }
   0xe   :  { %355 = vmatprep.subr.bf16.mxu0 %v354_v39  ;;  %v70_v55 = vld [vmem:[%s697_s2 + $0x140] sm:$0xff]  ;;  %v71_v57 = vld [vmem:[%s697_s2 + $0x148] sm:$0xff]  ;;  %v57_v59 = vld [vmem:[%s697_s2 + $0xd8] sm:$0xff]  ;;  %v360_v62 = vpack.c.bf16 %v39_v54, %v38_v53 }
   0xf   :  { %385 = vmatpush3.bf16.msra.mxu1 %v384_v38  ;;  %v88_v60 = vld [vmem:[%s697_s2 + $0x1d0] sm:$0xff]  ;;  %v89_v61 = vld [vmem:[%s697_s2 + $0x1d8] sm:$0xff]  ;;  %v392_v63 = vpack.c.bf16 %v71_v57, %v70_v55  ;;  %v362_v0 = vpack.c.bf16 %v57_v59, %v56_v58  ;;  %v58_v6 = vld [vmem:[%s697_s2 + $0xe0] sm:$0xff] }
  0x10   :  { %387 = vmatprep.subr.bf16.mxu1 %v386_v43  ;;  %v40_v1 = vld [vmem:[%s697_s2 + $0x50] sm:$0xff]  ;;  %v41_v2 = vld [vmem:[%s697_s2 + $0x58] sm:$0xff]  ;;  %v394_v4 = vpack.c.bf16 %v89_v61, %v88_v60  ;;  %v59_v7 = vld [vmem:[%s697_s2 + $0xe8] sm:$0xff] }
  0x11   :  { %357 = vmatpush3.bf16.msra.mxu0 %v356_v48  ;;  %v72_v3 = vld [vmem:[%s697_s2 + $0x150] sm:$0xff]  ;;  %v73_v5 = vld [vmem:[%s697_s2 + $0x158] sm:$0xff]  ;;  %v90_v8 = vld [vmem:[%s697_s2 + $0x1e0] sm:$0xff]  ;;  %v364_v10 = vpack.c.bf16 %v41_v2, %v40_v1  ;;  %v366_v15 = vpack.c.bf16 %v59_v7, %v58_v6 }
  0x12   :  { %359 = vmatprep.subr.bf16.mxu0 %v358_v52  ;;  %v91_v9 = vld [vmem:[%s697_s2 + $0x1e8] sm:$0xff]  ;;  %v42_v11 = vld [vmem:[%s697_s2 + $0x60] sm:$0xff]  ;;  %v396_v14 = vpack.c.bf16 %v73_v5, %v72_v3  ;;  %v60_v20 = vld [vmem:[%s697_s2 + $0xf0] sm:$0xff] }
  0x13   :  { %389 = vmatpush3.bf16.msra.mxu1 %v388_v51  ;;  %v43_v12 = vld [vmem:[%s697_s2 + $0x68] sm:$0xff]  ;;  %v74_v13 = vld [vmem:[%s697_s2 + $0x160] sm:$0xff]  ;;  %v398_v19 = vpack.c.bf16 %v91_v9, %v90_v8  ;;  %v61_v21 = vld [vmem:[%s697_s2 + $0xf8] sm:$0xff] }
  0x14   :  { %391 = vmatprep.subr.bf16.mxu1 %v390_v56  ;;  %v75_v16 = vld [vmem:[%s697_s2 + $0x168] sm:$0xff]  ;;  %v21_v23 = vld [vmem:[%s695_s0 + $0x18] sm:$0xff]  ;;  %v92_v24 = vld [vmem:[%s697_s2 + $0x1f0] sm:$0xff]  ;;  %v368_v27 = vpack.c.bf16 %v43_v12, %v42_v11 }
  0x15   :  { %361 = vmatpush3.bf16.msra.mxu0 %v360_v62  ;;  %v19_v17 = vld [vmem:[%s695_s0 + $0x8] sm:$0xff]  ;;  %v93_v25 = vld [vmem:[%s697_s2 + $0x1f8] sm:$0xff] }
  0x16   :  { %363 = vmatprep.subr.bf16.mxu0 %v362_v0  ;;  %v23_v18 = vld [vmem:[%s696_s1 + $0x8] sm:$0xff]  ;;  %v25_v26 = vld [vmem:[%s696_s1 + $0x18] sm:$0xff] }
  0x17   :  { %393 = vmatpush3.bf16.msra.mxu1 %v392_v63  ;;  %v27_v22 = vmul.f32 %v23_v18, %v19_v17  ;;  %v29_v28 = vmul.f32 %v25_v26, %v21_v23 }
  0x18   :  { %395 = vmatprep.subr.bf16.mxu1 %v394_v4 }
  0x19   :  { %365 = vmatpush3.bf16.msra.mxu0 %v364_v10  ;;  %165 = vmatprep.mubr.f32.mxu0 %v27_v22 }
  0x1a   :  { %9 = vsyncpa [#allocation3], 0  ;;  %367 = vmatprep.subr.bf16.mxu0 %v366_v15  ;;  %v400_v29 = vpack.c.bf16 %v75_v16, %v74_v13  ;;  %v370_v30 = vpack.c.bf16 %v61_v21, %v60_v20  ;;  %v44_v31 = vld [vmem:[%s697_s2 + $0x70] sm:$0xff]  ;;  %v45_v32 = vld [vmem:[%s697_s2 + $0x78] sm:$0xff]  ;;  %v402_v33 = vpack.c.bf16 %v93_v25, %v92_v24  ;;  %235 = vmatprep.mubr.f32.mxu1 %v29_v28  ;;  %vm244_vm1 = vcmask 48128  }
  0x1b   :  { %397 = vmatpush3.bf16.msra.mxu1 %v396_v14  ;;  %v76_v34 = vld [vmem:[%s697_s2 + $0x170] sm:$0xff]  ;;  %v77_v35 = vld [vmem:[%s697_s2 + $0x178] sm:$0xff]  ;;  %v372_v36 = vpack.c.bf16 %v45_v32, %v44_v31  ;;  %v18_v37 = vld [vmem:[%s695_s0] sm:$0xff] }
  0x1c   :  { %399 = vmatprep.subr.bf16.mxu1 %v398_v19  ;;  %v22_v38 = vld [vmem:[%s696_s1] sm:$0xff]  ;;  %v404_v39 = vpack.c.bf16 %v77_v35, %v76_v34  ;;  %v20_v40 = vld [vmem:[%s695_s0 + $0x10] sm:$0xff]  ;;  %s435_s0 = smov [#allocation2]  }
  0x1d   :  { %369 = vmatpush3.bf16.msra.mxu0 %v368_v27  ;;  %v24_v41 = vld [vmem:[%s696_s1 + $0x10] sm:$0xff]  ;;  %v26_v42 = vmul.f32 %v22_v38, %v18_v37  ;;  %v271_v45 = vld [vmem:[%s698_s3] ss:$0 sm:$0xff]  ;;  %s263_s1 = sshll.u32 %s435_s0, 4  ;;  %s264_s1 = int_to_ptr.vmem [resolvable:$true] %s263_s1 }
  0x1e   :  { %371 = vmatprep.subr.bf16.mxu0 %v370_v30  ;;  %v28_v43 = vmul.f32 %v24_v41, %v20_v40  ;;  %s411_s3 = scalar_lea.vmem %s264_s1, 128  ;;  %p416_p1 = scmp.lt.s32.totalorder %s264_s1, %s264_s1 }
  0x1f   :  { %401 = vmatpush3.bf16.msra.mxu1 %v400_v29  ;;  %p412_p0 = scmp.ne.s32.totalorder %s264_s1, %s411_s3  ;;  %p417_p2 = scmp.lt.s32.totalorder %s411_s3, %s411_s3 }
  0x20   :  { %403 = vmatprep.subr.bf16.mxu1 %v402_v33 }
  0x21   :  { %373 = vmatpush3.bf16.msra.mxu0 %v372_v36  ;;  %p418_p3 = por %p417_p2, %p416_p1 }
  0x23   :  { %405 = vmatpush3.bf16.msra.mxu1 %v404_v39  ;;  %p419_p4 = pnand %p418_p3, %p412_p0 }
  0x24   :  { %166 = vmatmul.mubr.f32.vlgmr.msra.gmra.mrb[0].mxu0 %v26_v42 }
  0x26   :  { %236 = vmatmul.mubr.f32.vlgmr.msra.gmra.mrb[0].mxu1 %v28_v43 }
  0xf7   :  { %v304_v44 = vpop.f32.mrb[0].mxu0 }
  0xf8   :  { %v305_v46 = vpop.f32.mrb[1].mxu0 }
  0xf9   :  { %v339_v47 = vpop.f32.mrb[0].mxu1  ;;  %v306_v48 = vadd.f32 %v305_v46, %v304_v44 }
  0xfa   :  { %v340_v49 = vpop.f32.mrb[1].mxu1 }
  0xfb   :  { %v341_v50 = vadd.f32 %v340_v49, %v339_v47  ;;  %v168_v51 = vadd.f32 %v306_v48, %v271_v45 }
  0xfd   :  { %v238_v52 = vadd.f32 %v341_v50, %v168_v51 }
  0xff   :  { %vm241_vm0 = vcmp.ge.f32.partialorder %v238_v52, 0.0  ;;  %v242_v53 = vmul.f32 0.2, %v238_v52 }
 0x101   :  { %v243_v54 = vsel %vm241_vm0, %v238_v52, %v242_v53 }
 0x102   :  { %v245_v55 = vsel %vm244_vm1, %v243_v54, -inf }
 0x103   :  { %246 = vmax.xlane.f32.xlu0 %v245_v55 }
 0x190   :  { %v247_v56 = vpop.xlane.xlu0 %246 }
 0x191   :  { %v248_v57 = vsub.f32 %v243_v54, %v247_v56 }
 0x193   :  { %v249_v58 = vmul.f32 1.442695, %v248_v57 }
 0x195   :  { %407 = vpow2.f32 %v249_v58 }
 0x19f   :  { %v408_v59 = vpop.eup %407 }
 0x1a0   :  { %v251_v60 = vsel %vm244_vm1, %v408_v59, 0.0 }
 0x1a1   :  { %252 = vadd.xlane.f32.xlu0 %v251_v60 }
 0x22e   :  { %v253_v61 = vpop.xlane.xlu0 %252 }
 0x22f   :  { %409 = vrcp.f32 %v253_v61 }
 0x239   :  { %v410_v62 = vpop.eup %409 }
 0x23a   :  { %v255_v63 = vmul.f32 %v410_v62, %v408_v59 }
 0x23c   :  { %256 = vst.msk [vmem:[#allocation2] sm:$0xff] %vm244_vm1, %v255_v63 }
 0x23d   :  { %422 = shalt.err (!%p419_p4)
}
 0x23e   :  { %s423_s6 = scalar_lea.hbm %s699_s4, 128 }
 0x23f   :  { %p424_p5 = scmp.ne.s32.totalorder %s699_s4, %s423_s6  ;;  %p427_p6 = scmp.lt.u32.totalorder %s423_s6, %s699_s4 }
 0x241   :  { %p429_p7 = pnand %p427_p6, %p424_p5 }
 0x243   :  { %432 = shalt.err (!%p429_p7)
}
 0x244   :  { %266 = dma.vmem_to_hbm [thread:$0]  %s264_s1, 128, %s699_s4, [#allocation3]  }
 0x245   :  { %433 = dma.done.wait [#allocation3], 128  }
 0x246   :  { %434 = vsyncadd [#allocation3], 4294967168 }
 0x247   :  { %270 = vsyncpa [#allocation3], 1 }

</bundles_post_ra>
